<compile_context>
chip_gen: v7x
topology: tpu7x:2x2x1
jax: 0.10.0
libtpu: 0.0.40
codegen_flags: <defaults>
</compile_context>

<pallas_src>
import functools

import jax
import jax.numpy as jnp
import numpy as np
from jax import lax
from jax.experimental import pallas as pl
from jax.experimental.pallas import tpu as pltpu

STEP_TYPE_LAST = 2  # alf.data_structures.StepType.LAST

_UNROLL_T_MAX = 64  # Python-unroll the time recurrence at or below this length.


def _td_loss_kernel(reward_ref, step_type_ref, discount_ref, value_ref,
                    target_value_ref, loss_ref, dm_ref, cm_ref,
                    *, gamma, td_lambda, fori_unroll):
    T, Bb = reward_ref.shape

    if T == 1:
        loss_ref[...] = jnp.zeros((T, Bb), loss_ref.dtype)
        return

    Tm1 = T - 1

    # ---- Dense full-tile preprocessing (lane-dense loads / VPU / stores) ----
    r1 = reward_ref[pl.ds(1, Tm1), :].astype(jnp.float32)
    d1 = discount_ref[pl.ds(1, Tm1), :].astype(jnp.float32) * gamma
    tv1 = target_value_ref[pl.ds(1, Tm1), :].astype(jnp.float32)
    tv0 = target_value_ref[pl.ds(0, Tm1), :].astype(jnp.float32)
    not_last = (step_type_ref[pl.ds(0, Tm1), :] != STEP_TYPE_LAST)
    nl = not_last.astype(jnp.float32)

    # Masked TD residual and masked lambda-weighted discount:
    #   adv[t] = dm[t] + cm[t] * adv[t+1]
    dm_ref[pl.ds(0, Tm1), :] = nl * (r1 + d1 * tv1 - tv0)
    cm_ref[pl.ds(0, Tm1), :] = nl * (td_lambda * d1)

    # ---- Row-serial backward recurrence; only carry is adv_next [1, Bb]. ----
    # adv rows are parked in the output tile (reused as scratch); the dense
    # loss epilogue below overwrites them with the final loss.
    def step(i, adv_next):
        t = Tm1 - 1 - i
        adv_t = dm_ref[pl.ds(t, 1), :] + cm_ref[pl.ds(t, 1), :] * adv_next
        loss_ref[pl.ds(t, 1), :] = adv_t
        return adv_t

    adv = jnp.zeros((1, Bb), jnp.float32)
    if Tm1 <= _UNROLL_T_MAX:
        # Small static T: full unroll (LLO scheduler sees everything).
        for i in range(Tm1):
            adv = step(i, adv)
    else:
        # Large T: bounded live ranges; unroll=8 amortizes loop overhead.
        lax.fori_loop(0, Tm1, step, adv, unroll=fori_unroll)

    # ---- Dense loss epilogue: one wide lane-dense store for rows [0, T-1). --
    adv_all = loss_ref[pl.ds(0, Tm1), :]
    tv0 = target_value_ref[pl.ds(0, Tm1), :].astype(jnp.float32)
    v0 = value_ref[pl.ds(0, Tm1), :].astype(jnp.float32)
    err = (adv_all + tv0) - v0                      # returns - value
    loss_ref[pl.ds(0, Tm1), :] = (err * err).astype(loss_ref.dtype)
    # tensor_extend_zero: last time row of the loss is zero.
    loss_ref[pl.ds(Tm1, 1), :] = jnp.zeros((1, Bb), loss_ref.dtype)


def _tpu_generation():
    """Return (two_tensorcores, vmem_budget_bytes, vmem_limit_bytes)."""
    kind = ""
    try:
        kind = jax.devices()[0].device_kind.lower()
    except Exception:  # pragma: no cover - defensive fallback
        pass
    mib = 1024 * 1024
    if "7" in kind:                        # v7x: 2 TCs, 64 MiB VMEM per TC
        return True, 20 * mib, 48 * mib
    if "v6" in kind:                       # v6e: 1 TC, 128 MiB VMEM
        return False, 22 * mib, 64 * mib
    if "v5p" in kind or "v4" in kind:      # megacore parts: 2 TCs
        return True, 16 * mib, 48 * mib
    if "v5" in kind:                       # v5e: 1 TC, 16 MiB scoped default
        return False, 12 * mib, 32 * mib
    return False, 12 * mib, 32 * mib       # unknown: conservative


def _choose_block_b(B, T, vmem_budget_bytes, two_cores, max_block_b=1024):
    """Lane-tile width (multiple of 128, VMEM-budgeted) and padded batch."""
    B128 = ((B + 127) // 128) * 128
    # Resident bytes per lane column of one block:
    #   (5 inputs + 1 output) double-buffered + 2 scratch tiles, f32, T rows.
    per_col_bytes = 4 * (12 * T + 2 * T)
    cap = (vmem_budget_bytes // max(per_col_bytes, 1)) // 128 * 128
    cap = max(128, min(cap, max_block_b))
    block_b = min(cap, B128)
    # Only on 2-TensorCore parts: ensure >= 2 parallel grid steps so
    # dimension_semantics=("parallel",) shards across both cores.
    if two_cores and B128 > 128 and B128 // block_b < 2:
        block_b = max(128, -(-(block_b // 2) // 128) * 128)
    b_pad = -(-B128 // block_b) * block_b
    return block_b, b_pad


def td_loss(reward, step_type, discount, value, target_value,
            *, gamma=0.99, td_lambda=0.95, max_block_b=1024):
    """Pallas TDLoss.forward. Returns (loss, extra) mimicking LossInfo."""
    T, B = reward.shape
    # TODO(synk): normalize_target (AdaptiveNormalizer running stats),
    # debug_summaries, multi-dim reward (per-dim gamma + mean over dim 2) and
    # the td_lambda == 0/1 special-cased return computations are not
    # implemented here (stateful / logging / shape variants).

    two_cores, vmem_budget, vmem_limit = _tpu_generation()
    block_b, b_pad = _choose_block_b(B, T, vmem_budget, two_cores, max_block_b)

    # Pad the batch only when needed (columns are independent; padded columns
    # are sliced away).  Pre-padded inputs upstream avoid this extra HBM pass.
    if b_pad != B:
        pad = ((0, 0), (0, b_pad - B))
        reward = jnp.pad(reward, pad)
        step_type = jnp.pad(step_type, pad)
        discount = jnp.pad(discount, pad)
        value = jnp.pad(value, pad)
        target_value = jnp.pad(target_value, pad)

    grid = (b_pad // block_b,)
    spec = pl.BlockSpec((T, block_b), lambda b: (0, b))
    kernel = functools.partial(_td_loss_kernel, gamma=float(gamma),
                               td_lambda=float(td_lambda), fori_unroll=8)

    loss = pl.pallas_call(
        kernel,
        out_shape=jax.ShapeDtypeStruct((T, b_pad), jnp.float32),
        grid_spec=pltpu.PrefetchScalarGridSpec(
            num_scalar_prefetch=0,
            grid=grid,
            in_specs=[spec, spec, spec, spec, spec],
            out_specs=spec,
            scratch_shapes=[pltpu.VMEM((T, block_b), jnp.float32),   # dm
                            pltpu.VMEM((T, block_b), jnp.float32)]), # cm
        compiler_params=pltpu.CompilerParams(
            dimension_semantics=("parallel",),
            vmem_limit_bytes=vmem_limit),
    )(reward, step_type, discount, value, target_value)

    if b_pad != B:
        loss = loss[:, :B]
    return loss, loss  # LossInfo(loss=loss, extra=loss)


def _reference(reward, step_type, discount, value, target_value,
               gamma=0.99, td_lambda=0.95):
    """Pure-numpy reference for verification (mirrors alf value_ops GAE)."""
    r = np.asarray(reward, np.float32)
    st = np.asarray(step_type)
    d = np.asarray(discount, np.float32) * gamma
    v = np.asarray(value, np.float32)
    tv = np.asarray(target_value, np.float32)
    T, B = r.shape
    is_last = (st == STEP_TYPE_LAST).astype(np.float32)
    delta = r[1:] + d[1:] * tv[1:] - tv[:-1]
    wdisc = d[1:] * td_lambda
    adv = np.zeros((T, B), np.float32)
    for t in range(T - 2, -1, -1):
        adv[t] = (1.0 - is_last[t]) * (delta[t] + wdisc[t] * adv[t + 1])
    adv = adv[:-1]
    returns = adv + tv[:-1]
    loss = (returns - v[:-1]) ** 2
    return np.concatenate([loss, np.zeros((1, B), np.float32)], axis=0)


def _make_inputs(key, T, B):
    k1, k2, k3, k4 = jax.random.split(key, 4)
    reward = jax.random.normal(k1, (T, B), jnp.float32)
    value = jax.random.normal(k2, (T, B), jnp.float32)
    target_value = value + 0.1 * jax.random.normal(k3, (T, B), jnp.float32)
    # step_type: FIRST (0) at t=0, mostly MID (1), ~10% LAST (2) boundaries.
    step_type = jnp.ones((T, B), jnp.int32)
    step_type = step_type.at[0, :].set(0)
    rand_last = (jax.random.uniform(k4, (T, B)) < 0.1).astype(jnp.int32)
    step_type = jnp.where(rand_last == 1, 2, step_type)
    # Realistic discount: 0 on LAST steps, 1 otherwise.
    discount = jnp.where(step_type == STEP_TYPE_LAST, 0.0, 1.0).astype(jnp.float32)
    return reward, step_type, discount, value, target_value


if __name__ == "__main__":
    key = jax.random.PRNGKey(0)
    k_small, k_large = jax.random.split(key, 2)

    # Small shapes: exercises the fully unrolled recurrence path.
    T, B = 8, 256
    reward, step_type, discount, value, target_value = _make_inputs(k_small, T, B)
    loss, extra = td_loss(reward, step_type, discount, value, target_value)
    loss = jax.block_until_ready(loss)
    ref = _reference(reward, step_type, discount, value, target_value)
    np.testing.assert_allclose(np.asarray(loss), ref, rtol=1e-4, atol=1e-5)
    np.testing.assert_allclose(np.asarray(extra), ref, rtol=1e-4, atol=1e-5)
    assert loss.shape == (T, B) and loss.dtype == jnp.float32

    # Larger T (> _UNROLL_T_MAX) with ragged B: exercises fori_loop + padding.
    T2, B2 = 80, 192
    reward2, step_type2, discount2, value2, target_value2 = _make_inputs(k_large, T2, B2)
    loss2, _ = td_loss(reward2, step_type2, discount2, value2, target_value2)
    loss2 = jax.block_until_ready(loss2)
    ref2 = _reference(reward2, step_type2, discount2, value2, target_value2)
    np.testing.assert_allclose(np.asarray(loss2), ref2, rtol=1e-4, atol=1e-5)
    assert loss2.shape == (T2, B2) and loss2.dtype == jnp.float32

    print("KERNEL_OK")
</pallas_src>

<mosaic_0001>
module attributes {stable_mosaic.version = 11 : i64} {
  func.func @_td_loss_kernel(%arg0: i32, %arg1: memref<8x256xf32, #tpu.memory_space<vmem>>, %arg2: memref<8x256xi32, #tpu.memory_space<vmem>>, %arg3: memref<8x256xf32, #tpu.memory_space<vmem>>, %arg4: memref<8x256xf32, #tpu.memory_space<vmem>>, %arg5: memref<8x256xf32, #tpu.memory_space<vmem>>, %arg6: memref<8x256xf32, #tpu.memory_space<vmem>>, %arg7: memref<8x256xf32, #tpu.memory_space<vmem>>, %arg8: memref<8x256xf32, #tpu.memory_space<vmem>>) attributes {dimension_semantics = [#tpu.dimension_semantics<parallel>], iteration_bounds = array<i64: 1>, scalar_prefetch = 0 : i64, scratch_operands = 2 : i64, tpu.core_type = #tpu.core_type<tc>, window_params = [{transform_indices = @transform_0, window_bounds = array<i64: 8, 256>}, {transform_indices = @transform_1, window_bounds = array<i64: 8, 256>}, {transform_indices = @transform_2, window_bounds = array<i64: 8, 256>}, {transform_indices = @transform_3, window_bounds = array<i64: 8, 256>}, {transform_indices = @transform_4, window_bounds = array<i64: 8, 256>}, {transform_indices = @transform_5, window_bounds = array<i64: 8, 256>}]} {
    %c1 = arith.constant 1 : index
    %c0 = arith.constant 0 : index
    %0 = vector.load %arg1[%c1, %c0] : memref<8x256xf32, #tpu.memory_space<vmem>>, vector<7x256xf32>
    %c1_0 = arith.constant 1 : index
    %c0_1 = arith.constant 0 : index
    %1 = vector.load %arg3[%c1_0, %c0_1] : memref<8x256xf32, #tpu.memory_space<vmem>>, vector<7x256xf32>
    %cst = arith.constant 9.900000e-01 : f32
    %2 = vector.broadcast %cst : f32 to vector<7x256xf32>
    %3 = arith.mulf %1, %2 : vector<7x256xf32>
    %c1_2 = arith.constant 1 : index
    %c0_3 = arith.constant 0 : index
    %4 = vector.load %arg5[%c1_2, %c0_3] : memref<8x256xf32, #tpu.memory_space<vmem>>, vector<7x256xf32>
    %c0_4 = arith.constant 0 : index
    %c0_5 = arith.constant 0 : index
    %5 = vector.load %arg5[%c0_4, %c0_5] : memref<8x256xf32, #tpu.memory_space<vmem>>, vector<7x256xf32>
    %c0_6 = arith.constant 0 : index
    %c0_7 = arith.constant 0 : index
    %6 = vector.load %arg2[%c0_6, %c0_7] : memref<8x256xi32, #tpu.memory_space<vmem>>, vector<7x256xi32>
    %c2_i32 = arith.constant 2 : i32
    %7 = vector.broadcast %c2_i32 : i32 to vector<7x256xi32>
    %8 = arith.cmpi ne, %6, %7 : vector<7x256xi32>
    %9 = arith.extui %8 : vector<7x256xi1> to vector<7x256xi32>
    %10 = arith.sitofp %9 : vector<7x256xi32> to vector<7x256xf32>
    %11 = arith.mulf %3, %4 : vector<7x256xf32>
    %12 = arith.addf %0, %11 : vector<7x256xf32>
    %13 = arith.subf %12, %5 : vector<7x256xf32>
    %14 = arith.mulf %10, %13 : vector<7x256xf32>
    %c0_8 = arith.constant 0 : index
    %c0_9 = arith.constant 0 : index
    %15 = vector.load %arg7[%c0_8, %c0_9] : memref<8x256xf32, #tpu.memory_space<vmem>>, vector<7x256xf32>
    tpu.vector_store %arg7[%c0_8, %c0_9], %14 {strides = array<i32>} : memref<8x256xf32, #tpu.memory_space<vmem>>, vector<7x256xf32>,
    %cst_10 = arith.constant 0.949999988 : f32
    %16 = vector.broadcast %cst_10 : f32 to vector<7x256xf32>
    %17 = arith.mulf %16, %3 : vector<7x256xf32>
    %18 = arith.mulf %10, %17 : vector<7x256xf32>
    %c0_11 = arith.constant 0 : index
    %c0_12 = arith.constant 0 : index
    %19 = vector.load %arg8[%c0_11, %c0_12] : memref<8x256xf32, #tpu.memory_space<vmem>>, vector<7x256xf32>
    tpu.vector_store %arg8[%c0_11, %c0_12], %18 {strides = array<i32>} : memref<8x256xf32, #tpu.memory_space<vmem>>, vector<7x256xf32>,
    %cst_13 = arith.constant 0.000000e+00 : f32
    %20 = vector.broadcast %cst_13 : f32 to vector<1x256xf32>
    %c6 = arith.constant 6 : index
    %c0_14 = arith.constant 0 : index
    %21 = vector.load %arg7[%c6, %c0_14] : memref<8x256xf32, #tpu.memory_space<vmem>>, vector<1x256xf32>
    %c6_15 = arith.constant 6 : index
    %c0_16 = arith.constant 0 : index
    %22 = vector.load %arg8[%c6_15, %c0_16] : memref<8x256xf32, #tpu.memory_space<vmem>>, vector<1x256xf32>
    %23 = arith.mulf %22, %20 : vector<1x256xf32>
    %24 = arith.addf %21, %23 : vector<1x256xf32>
    %c6_17 = arith.constant 6 : index
    %c0_18 = arith.constant 0 : index
    %25 = vector.load %arg6[%c6_17, %c0_18] : memref<8x256xf32, #tpu.memory_space<vmem>>, vector<1x256xf32>
    tpu.vector_store %arg6[%c6_17, %c0_18], %24 {strides = array<i32>} : memref<8x256xf32, #tpu.memory_space<vmem>>, vector<1x256xf32>,
    %c5 = arith.constant 5 : index
    %c0_19 = arith.constant 0 : index
    %26 = vector.load %arg7[%c5, %c0_19] : memref<8x256xf32, #tpu.memory_space<vmem>>, vector<1x256xf32>
    %c5_20 = arith.constant 5 : index
    %c0_21 = arith.constant 0 : index
    %27 = vector.load %arg8[%c5_20, %c0_21] : memref<8x256xf32, #tpu.memory_space<vmem>>, vector<1x256xf32>
    %28 = arith.mulf %27, %24 : vector<1x256xf32>
    %29 = arith.addf %26, %28 : vector<1x256xf32>
    %c5_22 = arith.constant 5 : index
    %c0_23 = arith.constant 0 : index
    %30 = vector.load %arg6[%c5_22, %c0_23] : memref<8x256xf32, #tpu.memory_space<vmem>>, vector<1x256xf32>
    tpu.vector_store %arg6[%c5_22, %c0_23], %29 {strides = array<i32>} : memref<8x256xf32, #tpu.memory_space<vmem>>, vector<1x256xf32>,
    %c4 = arith.constant 4 : index
    %c0_24 = arith.constant 0 : index
    %31 = vector.load %arg7[%c4, %c0_24] : memref<8x256xf32, #tpu.memory_space<vmem>>, vector<1x256xf32>
    %c4_25 = arith.constant 4 : index
    %c0_26 = arith.constant 0 : index
    %32 = vector.load %arg8[%c4_25, %c0_26] : memref<8x256xf32, #tpu.memory_space<vmem>>, vector<1x256xf32>
    %33 = arith.mulf %32, %29 : vector<1x256xf32>
    %34 = arith.addf %31, %33 : vector<1x256xf32>
    %c4_27 = arith.constant 4 : index
    %c0_28 = arith.constant 0 : index
    %35 = vector.load %arg6[%c4_27, %c0_28] : memref<8x256xf32, #tpu.memory_space<vmem>>, vector<1x256xf32>
    tpu.vector_store %arg6[%c4_27, %c0_28], %34 {strides = array<i32>} : memref<8x256xf32, #tpu.memory_space<vmem>>, vector<1x256xf32>,
    %c3 = arith.constant 3 : index
    %c0_29 = arith.constant 0 : index
    %36 = vector.load %arg7[%c3, %c0_29] : memref<8x256xf32, #tpu.memory_space<vmem>>, vector<1x256xf32>
    %c3_30 = arith.constant 3 : index
    %c0_31 = arith.constant 0 : index
    %37 = vector.load %arg8[%c3_30, %c0_31] : memref<8x256xf32, #tpu.memory_space<vmem>>, vector<1x256xf32>
    %38 = arith.mulf %37, %34 : vector<1x256xf32>
    %39 = arith.addf %36, %38 : vector<1x256xf32>
    %c3_32 = arith.constant 3 : index
    %c0_33 = arith.constant 0 : index
    %40 = vector.load %arg6[%c3_32, %c0_33] : memref<8x256xf32, #tpu.memory_space<vmem>>, vector<1x256xf32>
    tpu.vector_store %arg6[%c3_32, %c0_33], %39 {strides = array<i32>} : memref<8x256xf32, #tpu.memory_space<vmem>>, vector<1x256xf32>,
    %c2 = arith.constant 2 : index
    %c0_34 = arith.constant 0 : index
    %41 = vector.load %arg7[%c2, %c0_34] : memref<8x256xf32, #tpu.memory_space<vmem>>, vector<1x256xf32>
    %c2_35 = arith.constant 2 : index
    %c0_36 = arith.constant 0 : index
    %42 = vector.load %arg8[%c2_35, %c0_36] : memref<8x256xf32, #tpu.memory_space<vmem>>, vector<1x256xf32>
    %43 = arith.mulf %42, %39 : vector<1x256xf32>
    %44 = arith.addf %41, %43 : vector<1x256xf32>
    %c2_37 = arith.constant 2 : index
    %c0_38 = arith.constant 0 : index
    %45 = vector.load %arg6[%c2_37, %c0_38] : memref<8x256xf32, #tpu.memory_space<vmem>>, vector<1x256xf32>
    tpu.vector_store %arg6[%c2_37, %c0_38], %44 {strides = array<i32>} : memref<8x256xf32, #tpu.memory_space<vmem>>, vector<1x256xf32>,
    %c1_39 = arith.constant 1 : index
    %c0_40 = arith.constant 0 : index
    %46 = vector.load %arg7[%c1_39, %c0_40] : memref<8x256xf32, #tpu.memory_space<vmem>>, vector<1x256xf32>
    %c1_41 = arith.constant 1 : index
    %c0_42 = arith.constant 0 : index
    %47 = vector.load %arg8[%c1_41, %c0_42] : memref<8x256xf32, #tpu.memory_space<vmem>>, vector<1x256xf32>
    %48 = arith.mulf %47, %44 : vector<1x256xf32>
    %49 = arith.addf %46, %48 : vector<1x256xf32>
    %c1_43 = arith.constant 1 : index
    %c0_44 = arith.constant 0 : index
    %50 = vector.load %arg6[%c1_43, %c0_44] : memref<8x256xf32, #tpu.memory_space<vmem>>, vector<1x256xf32>
    tpu.vector_store %arg6[%c1_43, %c0_44], %49 {strides = array<i32>} : memref<8x256xf32, #tpu.memory_space<vmem>>, vector<1x256xf32>,
    %c0_45 = arith.constant 0 : index
    %c0_46 = arith.constant 0 : index
    %51 = vector.load %arg7[%c0_45, %c0_46] : memref<8x256xf32, #tpu.memory_space<vmem>>, vector<1x256xf32>
    %c0_47 = arith.constant 0 : index
    %c0_48 = arith.constant 0 : index
    %52 = vector.load %arg8[%c0_47, %c0_48] : memref<8x256xf32, #tpu.memory_space<vmem>>, vector<1x256xf32>
    %53 = arith.mulf %52, %49 : vector<1x256xf32>
    %54 = arith.addf %51, %53 : vector<1x256xf32>
    %c0_49 = arith.constant 0 : index
    %c0_50 = arith.constant 0 : index
    %55 = vector.load %arg6[%c0_49, %c0_50] : memref<8x256xf32, #tpu.memory_space<vmem>>, vector<1x256xf32>
    tpu.vector_store %arg6[%c0_49, %c0_50], %54 {strides = array<i32>} : memref<8x256xf32, #tpu.memory_space<vmem>>, vector<1x256xf32>,
    %c0_51 = arith.constant 0 : index
    %c0_52 = arith.constant 0 : index
    %56 = vector.load %arg6[%c0_51, %c0_52] : memref<8x256xf32, #tpu.memory_space<vmem>>, vector<7x256xf32>
    %c0_53 = arith.constant 0 : index
    %c0_54 = arith.constant 0 : index
    %57 = vector.load %arg5[%c0_53, %c0_54] : memref<8x256xf32, #tpu.memory_space<vmem>>, vector<7x256xf32>
    %c0_55 = arith.constant 0 : index
    %c0_56 = arith.constant 0 : index
    %58 = vector.load %arg4[%c0_55, %c0_56] : memref<8x256xf32, #tpu.memory_space<vmem>>, vector<7x256xf32>
    %59 = arith.addf %56, %57 : vector<7x256xf32>
    %60 = arith.subf %59, %58 : vector<7x256xf32>
    %61 = arith.mulf %60, %60 : vector<7x256xf32>
    %c0_57 = arith.constant 0 : index
    %c0_58 = arith.constant 0 : index
    %62 = vector.load %arg6[%c0_57, %c0_58] : memref<8x256xf32, #tpu.memory_space<vmem>>, vector<7x256xf32>
    tpu.vector_store %arg6[%c0_57, %c0_58], %61 {strides = array<i32>} : memref<8x256xf32, #tpu.memory_space<vmem>>, vector<7x256xf32>,
    %cst_59 = arith.constant 0.000000e+00 : f32
    %63 = vector.broadcast %cst_59 : f32 to vector<1x256xf32>
    %c7 = arith.constant 7 : index
    %c0_60 = arith.constant 0 : index
    %64 = vector.load %arg6[%c7, %c0_60] : memref<8x256xf32, #tpu.memory_space<vmem>>, vector<1x256xf32>
    tpu.vector_store %arg6[%c7, %c0_60], %63 {strides = array<i32>} : memref<8x256xf32, #tpu.memory_space<vmem>>, vector<1x256xf32>,
    return
  }
  func.func @transform_0(%arg0: i32) -> (i32, i32) {
    %c0_i32 = arith.constant 0 : i32
    %c0_i32_0 = arith.constant 0 : i32
    return %c0_i32, %arg0 : i32, i32
  }
  func.func @transform_1(%arg0: i32) -> (i32, i32) {
    %c0_i32 = arith.constant 0 : i32
    %c0_i32_0 = arith.constant 0 : i32
    return %c0_i32, %arg0 : i32, i32
  }
  func.func @transform_2(%arg0: i32) -> (i32, i32) {
    %c0_i32 = arith.constant 0 : i32
    %c0_i32_0 = arith.constant 0 : i32
    return %c0_i32, %arg0 : i32, i32
  }
  func.func @transform_3(%arg0: i32) -> (i32, i32) {
    %c0_i32 = arith.constant 0 : i32
    %c0_i32_0 = arith.constant 0 : i32
    return %c0_i32, %arg0 : i32, i32
  }
  func.func @transform_4(%arg0: i32) -> (i32, i32) {
    %c0_i32 = arith.constant 0 : i32
    %c0_i32_0 = arith.constant 0 : i32
    return %c0_i32, %arg0 : i32, i32
  }
  func.func @transform_5(%arg0: i32) -> (i32, i32) {
    %c0_i32 = arith.constant 0 : i32
    %c0_i32_0 = arith.constant 0 : i32
    return %c0_i32, %arg0 : i32, i32
  }
}

</mosaic_0001>

<bundles_post_ra>
// kernel: tpu_custom_call.1
= control target key start
LH: loop header
LB: loop body
LE: loop exit
PB: predicated region body
PF: predicated region fallthrough
CT: control target
= control target key end

     0   :  { %10 = vsyncpa [#allocation5], 0  ;;  %s507_s0 = inlined_call_operand.hbm [shape: f32[8,256], index: 0, kind: input, shape index: {}]   ;;  %s508_s1 = inlined_call_operand.hbm [shape: s32[8,256], index: 1, kind: input, shape index: {}]   ;;  %s509_s2 = inlined_call_operand.hbm [shape: f32[8,256], index: 2, kind: input, shape index: {}]   ;;  %s510_s3 = inlined_call_operand.hbm [shape: f32[8,256], index: 3, kind: input, shape index: {}]   ;;  %s511_s4 = inlined_call_operand.hbm [shape: f32[8,256], index: 4, kind: input, shape index: {}]   ;;  %s512_s5 = inlined_call_operand.hbm [shape: f32[8,256], index: 5, kind: output, shape index: {}]  }
   0x1   :  { %11 = vsyncpa [#allocation8], 0 }
   0x2   :  { %12 = vsyncpa [#allocation11], 0 }
   0x3   :  { %13 = vsyncpa [#allocation6], 0  ;;  %s378_s18 = smov [#allocation7]   ;;  %s379_s20 = smov [#allocation10]  }
   0x4   :  { %s30_s19 = sshll.u32 %s378_s18, 4  ;;  %s50_s21 = sshll.u32 %s379_s20, 4  ;;  %s31_s19 = int_to_ptr.vmem [resolvable:$true] %s30_s19  ;;  %s51_s21 = int_to_ptr.vmem [resolvable:$true] %s50_s21 }
   0x5   :  { %s238_s24 = scalar_lea.hbm %s508_s1, 256 }
   0x6   :  { %p239_p0 = scmp.ne.s32.totalorder %s508_s1, %s238_s24  ;;  %p242_p1 = scmp.lt.u32.totalorder %s238_s24, %s508_s1 }
   0x8   :  { %p244_p2 = pnand %p242_p1, %p239_p0 }
   0xa   :  { %247 = shalt.err (!%p244_p2)
}
   0xb   :  { %s248_s29 = scalar_lea.vmem %s31_s19, 256  ;;  %p253_p4 = scmp.lt.s32.totalorder %s31_s19, %s31_s19 }
   0xc   :  { %p249_p3 = scmp.ne.s32.totalorder %s31_s19, %s248_s29  ;;  %p254_p5 = scmp.lt.s32.totalorder %s248_s29, %s248_s29 }
   0xe   :  { %p255_p6 = por %p254_p5, %p253_p4 }
  0x10   :  { %p256_p7 = pnand %p255_p6, %p249_p3 }
  0x12   :  { %259 = shalt.err (!%p256_p7)
}
  0x13   :  { %33 = dma.hbm_to_vmem [thread:$0]  %s508_s1, 256, %s31_s19, [#allocation8]  }
  0x14   :  { %s260_s9 = scalar_lea.hbm %s510_s3, 256 }
  0x15   :  { %p261_p8 = scmp.ne.s32.totalorder %s510_s3, %s260_s9  ;;  %p264_p9 = scmp.lt.u32.totalorder %s260_s9, %s510_s3 }
  0x17   :  { %p266_p10 = pnand %p264_p9, %p261_p8 }
  0x19   :  { %269 = shalt.err (!%p266_p10)
}
  0x1a   :  { %s270_s14 = scalar_lea.vmem %s51_s21, 256  ;;  %p275_p12 = scmp.lt.s32.totalorder %s51_s21, %s51_s21 }
  0x1b   :  { %p271_p11 = scmp.ne.s32.totalorder %s51_s21, %s270_s14  ;;  %p276_p13 = scmp.lt.s32.totalorder %s270_s14, %s270_s14 }
  0x1d   :  { %p277_p0 = por %p276_p13, %p275_p12 }
  0x1f   :  { %p278_p1 = pnand %p277_p0, %p271_p11 }
  0x21   :  { %281 = shalt.err (!%p278_p1)
}
  0x22   :  { %53 = dma.hbm_to_vmem [thread:$0]  %s510_s3, 256, %s51_s21, [#allocation11]  }
  0x23   :  { %s380_s16 = smov [#allocation4]   ;;  %s381_s18 = smov [#allocation9]  }
  0x24   :  { %s20_s17 = sshll.u32 %s380_s16, 4  ;;  %s40_s19 = sshll.u32 %s381_s18, 4  ;;  %s21_s17 = int_to_ptr.vmem [resolvable:$true] %s20_s17  ;;  %s41_s19 = int_to_ptr.vmem [resolvable:$true] %s40_s19 }
  0x25   :  { %s282_s23 = scalar_lea.hbm %s507_s0, 256 }
  0x26   :  { %p283_p2 = scmp.ne.s32.totalorder %s507_s0, %s282_s23  ;;  %p286_p3 = scmp.lt.u32.totalorder %s282_s23, %s507_s0 }
  0x28   :  { %p288_p4 = pnand %p286_p3, %p283_p2 }
  0x2a   :  { %291 = shalt.err (!%p288_p4)
}
  0x2b   :  { %s292_s3 = scalar_lea.vmem %s21_s17, 256  ;;  %p297_p6 = scmp.lt.s32.totalorder %s21_s17, %s21_s17 }
  0x2c   :  { %p293_p5 = scmp.ne.s32.totalorder %s21_s17, %s292_s3  ;;  %p298_p7 = scmp.lt.s32.totalorder %s292_s3, %s292_s3 }
  0x2e   :  { %p299_p8 = por %p298_p7, %p297_p6 }
  0x30   :  { %p300_p9 = pnand %p299_p8, %p293_p5 }
  0x32   :  { %303 = shalt.err (!%p300_p9)
}
  0x33   :  { %23 = dma.hbm_to_vmem [thread:$0]  %s507_s0, 256, %s21_s17, [#allocation5]  }
  0x34   :  { %s304_s6 = scalar_lea.hbm %s509_s2, 256 }
  0x35   :  { %p305_p10 = scmp.ne.s32.totalorder %s509_s2, %s304_s6  ;;  %p308_p11 = scmp.lt.u32.totalorder %s304_s6, %s509_s2 }
  0x37   :  { %p310_p12 = pnand %p308_p11, %p305_p10 }
  0x39   :  { %313 = shalt.err (!%p310_p12)
}
  0x3a   :  { %s314_s11 = scalar_lea.vmem %s41_s19, 256  ;;  %p319_p0 = scmp.lt.s32.totalorder %s41_s19, %s41_s19 }
  0x3b   :  { %p315_p13 = scmp.ne.s32.totalorder %s41_s19, %s314_s11  ;;  %p320_p1 = scmp.lt.s32.totalorder %s314_s11, %s314_s11 }
  0x3d   :  { %p321_p2 = por %p320_p1, %p319_p0 }
  0x3f   :  { %p322_p3 = pnand %p321_p2, %p315_p13 }
  0x41   :  { %325 = shalt.err (!%p322_p3)
}
  0x42   :  { %43 = dma.hbm_to_vmem [thread:$0]  %s509_s2, 256, %s41_s19, [#allocation8]  }
  0x43   :  { %s382_s13 = smov [#allocation12]   ;;  %s326_s16 = scalar_lea.hbm %s511_s4, 256 }
  0x44   :  { %s60_s14 = sshll.u32 %s382_s13, 4  ;;  %p327_p4 = scmp.ne.s32.totalorder %s511_s4, %s326_s16  ;;  %s61_s14 = int_to_ptr.vmem [resolvable:$true] %s60_s14 }
  0x45   :  { %p330_p5 = scmp.lt.u32.totalorder %s326_s16, %s511_s4 }
  0x47   :  { %p332_p6 = pnand %p330_p5, %p327_p4 }
  0x49   :  { %335 = shalt.err (!%p332_p6)
}
  0x4a   :  { %s336_s23 = scalar_lea.vmem %s61_s14, 256  ;;  %p341_p8 = scmp.lt.s32.totalorder %s61_s14, %s61_s14 }
  0x4b   :  { %p337_p7 = scmp.ne.s32.totalorder %s61_s14, %s336_s23  ;;  %p342_p9 = scmp.lt.s32.totalorder %s336_s23, %s336_s23 }
  0x4d   :  { %p343_p10 = por %p342_p9, %p341_p8 }
  0x4f   :  { %p344_p11 = pnand %p343_p10, %p337_p7 }
  0x51   :  { %347 = shalt.err (!%p344_p11)
}
  0x52   :  { %63 = dma.hbm_to_vmem [thread:$0]  %s511_s4, 256, %s61_s14, [#allocation11]  }
  0x53   :  { %370 = dma.done.wait [#allocation5], 256  }
  0x54   :  { %371 = vsyncadd [#allocation5], 4294967040 }
  0x55   :  { %372 = dma.done.wait [#allocation8], 512  }
  0x56   :  { %373 = vsyncadd [#allocation8], 4294966784 }
  0x57   :  { %374 = dma.done.wait [#allocation11], 512  }
  0x58   :  { %375 = vsyncadd [#allocation11], 4294966784  ;;  %v137_v0 = vlaneseq  ;;  %v383_v2 = vmov 0.0   ;;  %v81_v3 = vld [vmem:[#allocation9] sm:$0xfe]  ;;  %s384_s4 = smov [#allocation13]  }
  0x59   :  { %v89_v4 = vld [vmem:[#allocation7] sm:$0x7f]  ;;  %v82_v5 = vld [vmem:[#allocation9 + $0x8] sm:$0xfe]  ;;  %v83_v6 = vmul.f32 0.99, %v81_v3 }
  0x5a   :  { %vm475_vm0 = vcmp.lt.s32.totalorder %v137_v0, 256  ;;  %vm91_vm1 = vcmp.ne.s32.totalorder %v89_v4, 2  ;;  %v84_v7 = vmul.f32 0.99, %v82_v5  ;;  %v90_v8 = vld [vmem:[#allocation7 + $0x8] sm:$0x7f] }
  0x5b   :  { %210 = vst.msk [vmem:[#allocation13 + $0x7] ss:$8 sm:$0x3] %vm475_vm0, %v383_v2  ;;  %v79_v9 = vld [vmem:[#allocation4] sm:$0xfe]  ;;  %vm92_vm2 = vcmp.ne.s32.totalorder %v90_v8, 2 }
  0x5c   :  { %v119_v10 = vmul.f32 0.95, %v83_v6  ;;  %v120_v11 = vmul.f32 0.95, %v84_v7  ;;  %v229_v12 = vsel %vm91_vm1, 1.0, %v383_v2  ;;  %v230_v13 = vsel %vm92_vm2, 1.0, %v383_v2 }
  0x5d   :  { %v85_v14 = vld [vmem:[#allocation12] sm:$0xfe]  ;;  %v80_v20 = vld [vmem:[#allocation4 + $0x8] sm:$0xfe]  ;;  %v199_v2 = vld [vmem:[#allocation10] sm:$0x7f] }
  0x5e   :  { %v87_v15 = vld [vmem:[#allocation12] sm:$0x7f]  ;;  %v123_v16 = vrot.slane %v119_v10, 1  ;;  %v124_v17 = vrot.slane %v120_v11, 1  ;;  %v97_v18 = vmul.f32 %v85_v14, %v83_v6  ;;  %v86_v21 = vld [vmem:[#allocation12 + $0x8] sm:$0xfe] }
  0x5f   :  { %v103_v19 = vrot.slane %v87_v15, 7  ;;  %v88_v22 = vld [vmem:[#allocation12 + $0x8] sm:$0x7f]  ;;  %v98_v26 = vmul.f32 %v86_v21, %v84_v7  ;;  %v197_v63 = vld [vmem:[#allocation12] sm:$0x7f]  ;;  %s218_s24 = sshll.u32 %s384_s4, 4  ;;  %s219_s24 = int_to_ptr.vmem [resolvable:$true] %s218_s24 }
  0x60   :  { %v127_v23 = vmul.f32 %v229_v12, %v123_v16  ;;  %v128_v24 = vmul.f32 %v230_v13, %v124_v17  ;;  %v99_v25 = vadd.f32 %v97_v18, %v79_v9  ;;  %v104_v27 = vrot.slane %v88_v22, 7  ;;  %v198_v0 = vld [vmem:[#allocation12 + $0x8] sm:$0x7f]  ;;  %v200_v5 = vld [vmem:[#allocation10 + $0x8] sm:$0x7f]  ;;  %s348_s25 = scalar_lea.vmem %s219_s24, 256  ;;  %p353_p13 = scmp.lt.s32.totalorder %s219_s24, %s219_s24 }
  0x61   :  { %v100_v29 = vadd.f32 %v98_v26, %v80_v20  ;;  %p349_p12 = scmp.ne.s32.totalorder %s219_s24, %s348_s25  ;;  %p354_p0 = scmp.lt.s32.totalorder %s348_s25, %s348_s25 }
  0x62   :  { %129 = vst [vmem:[#allocation3] sm:$0x7f] %v127_v23  ;;  %130 = vst [vmem:[#allocation3 + $0x8] sm:$0x7f] %v128_v24  ;;  %v107_v28 = vsub.f32 %v99_v25, %v103_v19 }
  0x63   :  { %v108_v31 = vsub.f32 %v100_v29, %v104_v27  ;;  %p355_p1 = por %p354_p0, %p353_p13 }
  0x64   :  { %v111_v30 = vrot.slane %v107_v28, 1 }
  0x65   :  { %v112_v33 = vrot.slane %v108_v31, 1  ;;  %p356_p2 = pnand %p355_p1, %p349_p12 }
  0x66   :  { %v115_v32 = vmul.f32 %v229_v12, %v111_v30 }
  0x67   :  { %v116_v34 = vmul.f32 %v230_v13, %v112_v33 }
  0x68   :  { %117 = vst [vmem:[#allocation2] sm:$0x7f] %v115_v32 }
  0x69   :  { %118 = vst [vmem:[#allocation2 + $0x8] sm:$0x7f] %v116_v34  ;;  %v134_v35 = vld [vmem:[#allocation3 + $0x6] ss:$8 sm:$0x3] }
  0x6a   :  { %v135_v36 = vmul.f32 0.0, %v134_v35  ;;  %v147_v39 = vld [vmem:[#allocation3 + $0x5] ss:$8 sm:$0x3] }
  0x6b   :  { %v156_v43 = vld [vmem:[#allocation3 + $0x4] ss:$8 sm:$0x3]  ;;  %v165_v47 = vld [vmem:[#allocation3 + $0x3] ss:$8 sm:$0x3] }
  0x6c   :  { %v174_v51 = vld [vmem:[#allocation3 + $0x2] ss:$8 sm:$0x3]  ;;  %v183_v55 = vld [vmem:[#allocation3 + $0x1] ss:$8 sm:$0x3] }
  0x6d   :  { %v190_v59 = vld [vmem:[#allocation3] ss:$8 sm:$0x3] }
  0x70   :  { %v132_v37 = vld [vmem:[#allocation2 + $0x6] ss:$8 sm:$0x3]  ;;  %v145_v41 = vld [vmem:[#allocation2 + $0x5] ss:$8 sm:$0x3] }
  0x71   :  { %v136_v38 = vadd.f32 %v135_v36, %v132_v37  ;;  %v154_v45 = vld [vmem:[#allocation2 + $0x4] ss:$8 sm:$0x3]  ;;  %v163_v49 = vld [vmem:[#allocation2 + $0x3] ss:$8 sm:$0x3] }
  0x72   :  { %v172_v53 = vld [vmem:[#allocation2 + $0x2] ss:$8 sm:$0x3]  ;;  %v181_v57 = vld [vmem:[#allocation2 + $0x1] ss:$8 sm:$0x3] }
  0x73   :  { %142 = vst.msk [vmem:[#allocation13 + $0x6] ss:$8 sm:$0x3] %vm475_vm0, %v136_v38  ;;  %v148_v40 = vmul.f32 %v147_v39, %v136_v38  ;;  %v189_v61 = vld [vmem:[#allocation2] ss:$8 sm:$0x3] }
  0x75   :  { %v149_v42 = vadd.f32 %v148_v40, %v145_v41 }
  0x77   :  { %151 = vst.msk [vmem:[#allocation13 + $0x5] ss:$8 sm:$0x3] %vm475_vm0, %v149_v42  ;;  %v157_v44 = vmul.f32 %v156_v43, %v149_v42 }
  0x79   :  { %v158_v46 = vadd.f32 %v157_v44, %v154_v45 }
  0x7b   :  { %160 = vst.msk [vmem:[#allocation13 + $0x4] ss:$8 sm:$0x3] %vm475_vm0, %v158_v46  ;;  %v166_v48 = vmul.f32 %v165_v47, %v158_v46 }
  0x7d   :  { %v167_v50 = vadd.f32 %v166_v48, %v163_v49 }
  0x7f   :  { %169 = vst.msk [vmem:[#allocation13 + $0x3] ss:$8 sm:$0x3] %vm475_vm0, %v167_v50  ;;  %v175_v52 = vmul.f32 %v174_v51, %v167_v50 }
  0x81   :  { %v176_v54 = vadd.f32 %v175_v52, %v172_v53 }
  0x83   :  { %178 = vst.msk [vmem:[#allocation13 + $0x2] ss:$8 sm:$0x3] %vm475_vm0, %v176_v54  ;;  %v184_v56 = vmul.f32 %v183_v55, %v176_v54 }
  0x85   :  { %v185_v58 = vadd.f32 %v184_v56, %v181_v57 }
  0x87   :  { %187 = vst.msk [vmem:[#allocation13 + $0x1] ss:$8 sm:$0x3] %vm475_vm0, %v185_v58  ;;  %v191_v60 = vmul.f32 %v190_v59, %v185_v58 }
  0x89   :  { %v192_v62 = vadd.f32 %v191_v60, %v189_v61 }
  0x8b   :  { %193 = vst.msk [vmem:[#allocation13] ss:$8 sm:$0x3] %vm475_vm0, %v192_v62 }
  0x92   :  { %v195_v3 = vld [vmem:[#allocation13] sm:$0x7f]  ;;  %v196_v4 = vld [vmem:[#allocation13 + $0x8] sm:$0x7f] }
  0x93   :  { %v201_v6 = vadd.f32 %v197_v63, %v195_v3  ;;  %v202_v7 = vadd.f32 %v198_v0, %v196_v4 }
  0x95   :  { %v203_v8 = vsub.f32 %v201_v6, %v199_v2  ;;  %v204_v9 = vsub.f32 %v202_v7, %v200_v5 }
  0x97   :  { %v205_v10 = vmul.f32 %v203_v8, %v203_v8  ;;  %v206_v11 = vmul.f32 %v204_v9, %v204_v9 }
  0x99   :  { %207 = vst [vmem:[#allocation13] sm:$0x7f] %v205_v10  ;;  %208 = vst [vmem:[#allocation13 + $0x8] sm:$0x7f] %v206_v11 }
  0x9a   :  { %359 = shalt.err (!%p356_p2)
}
  0x9b   :  { %s360_s3 = scalar_lea.hbm %s512_s5, 256 }
  0x9c   :  { %p361_p3 = scmp.ne.s32.totalorder %s512_s5, %s360_s3  ;;  %p364_p4 = scmp.lt.u32.totalorder %s360_s3, %s512_s5 }
  0x9e   :  { %p366_p5 = pnand %p364_p4, %p361_p3 }
  0xa0   :  { %369 = shalt.err (!%p366_p5)
}
  0xa1   :  { %221 = dma.vmem_to_hbm [thread:$0]  %s219_s24, 256, %s512_s5, [#allocation6]  }
  0xa2   :  { %376 = dma.done.wait [#allocation6], 256  }
  0xa3   :  { %377 = vsyncadd [#allocation6], 4294967040 }
  0xa4   :  { %225 = vsyncpa [#allocation5], 1 }
  0xa5   :  { %226 = vsyncpa [#allocation8], 1 }
  0xa6   :  { %227 = vsyncpa [#allocation11], 1 }
  0xa7   :  { %228 = vsyncpa [#allocation6], 1 }

</bundles_post_ra>
